<compile_context>
chip_gen: v7x
topology: tpu7x:2x2x1
jax: 0.10.0
libtpu: 0.0.40
codegen_flags: <defaults>
</compile_context>

<pallas_src>
import jax
import jax.numpy as jnp
from jax.experimental import pallas as pl
from jax.experimental.pallas import tpu as pltpu


def _copy_kernel(x_ref, o_ref):
    # Pure element-wise pass-through of the current VMEM tile.
    o_ref[...] = x_ref[...]


_LANES = (2048, 1024, 512, 256, 128)      # lane-dense store widths (mult. of 128)
_MAX_TILE_BYTES = 4 * 1024 * 1024         # per-tile cap -> <=16 MiB resident (x4 bufs)
_VMEM_LIMIT_BYTES = 32 * 1024 * 1024      # explicit scoped-VMEM limit, safe on v5e/v6e/v7x
_SPLIT_THRESHOLD_BYTES = 2 * 1024 * 1024  # split bigger slabs into >=4 grid steps
_MIN_SPLIT_STEPS = 4


def _round_up(v: int, m: int) -> int:
    return -(-v // m) * m


def _choose_lane_width(total: int):
    """Widest lane width (multiple of 128) that divides `total` exactly.

    Preference order: row count a multiple of 32 (fully packed vregs for all
    dtypes), then a multiple of 8, then any exact divisor.  Returns None if
    `total` is not a multiple of 128 (caller falls back to a single block).
    """
    for rows_mult in (32, 8, 1):
        for lane in _LANES:
            if total % lane == 0 and (total // lane) % rows_mult == 0:
                return lane
    return None


@jax.jit
def pallas_identity(x: jax.Array) -> jax.Array:
    """Lane-dense, tiled, pipelined identity copy (no padding, no aliasing)."""
    orig_shape = x.shape
    dtype = x.dtype
    total = int(x.size)
    itemsize = jnp.dtype(dtype).itemsize

    lane = _choose_lane_width(total)
    if lane is None:
        # Element count not a multiple of 128: single block equal to the full
        # (flattened) array — always a legal block shape, still no padding.
        # TODO(synk): very large unaligned inputs would need an in-kernel
        # masked tail instead of this single-block fallback; not needed here.
        x2d = x.reshape(1, total)
        out = pl.pallas_call(
            _copy_kernel,
            out_shape=jax.ShapeDtypeStruct((1, total), dtype),
        )(x2d)
        return out.reshape(orig_shape)

    rows = total // lane
    x2d = x.reshape(rows, lane)           # metadata-only reshape, no HBM pass
    slab_bytes = total * itemsize

    # Largest row tile keeping one tile <= 4 MiB, rounded to 32 sublanes.
    max_rows = max(32, (_MAX_TILE_BYTES // (lane * itemsize)) // 32 * 32)
    row_tile = min(rows, max_rows)

    # If the slab would collapse into a single grid step but is big enough to
    # matter, split it into >= _MIN_SPLIT_STEPS steps so the "parallel" grid
    # axis uses both of v7x's TensorCores and the DMA pipeline has work.
    if (
        row_tile == rows
        and slab_bytes > _SPLIT_THRESHOLD_BYTES
        and rows >= 32 * _MIN_SPLIT_STEPS
    ):
        row_tile = max(32, _round_up(pl.cdiv(rows, _MIN_SPLIT_STEPS), 32))

    # Partial blocks must stay (8,128)-aligned; only a full-extent block may
    # have an unaligned sublane count.  (Defensive — row_tile is a multiple of
    # 32 whenever it differs from rows.)
    if row_tile != rows and row_tile % 8 != 0:
        row_tile = rows

    grid = (pl.cdiv(rows, row_tile),)     # ragged last block handled by Pallas

    out2d = pl.pallas_call(
        _copy_kernel,
        out_shape=jax.ShapeDtypeStruct((rows, lane), dtype),
        grid=grid,
        in_specs=[pl.BlockSpec((row_tile, lane), lambda i: (i, 0))],
        out_specs=pl.BlockSpec((row_tile, lane), lambda i: (i, 0)),
        compiler_params=pltpu.CompilerParams(
            dimension_semantics=("parallel",),
            vmem_limit_bytes=_VMEM_LIMIT_BYTES,
        ),
    )(x2d)

    return out2d.reshape(orig_shape)


class DecoderBlockPallas:
    """JAX/Pallas counterpart of the (empty) PyTorch DecoderBlock."""

    def __init__(self) -> None:
        # Reference __init__ defines no parameters; nothing to initialize.
        pass

    def forward(self, x):
        # Reference forward body is `pass` -> returns None and does no math.
        # Per the perf review, the dead identity copy (a full HBM read+write of
        # x plus a host sync) has been removed: this is now a true no-op.
        del x
        return None

    __call__ = forward


if __name__ == "__main__":
    key = jax.random.PRNGKey(0)
    # Small NCHW-style input consistent with the suggested shapes.
    x = jax.random.normal(key, (2, 4, 16, 16), dtype=jnp.float32)

    # Exercise the Pallas kernel once (identity copy of x) and block on it.
    y = pallas_identity(x)
    jax.block_until_ready(y)
    assert y.shape == x.shape and y.dtype == x.dtype
    assert bool(jnp.array_equal(y, x))

    # Semantically-exact module call: returns None, like the PyTorch forward.
    block = DecoderBlockPallas()
    assert block(x) is None

    print("KERNEL_OK")
</pallas_src>

<mosaic_0001>
module attributes {stable_mosaic.version = 11 : i64} {
  func.func @_copy_kernel(%arg0: i32, %arg1: memref<8x256xf32, #tpu.memory_space<vmem>>, %arg2: memref<8x256xf32, #tpu.memory_space<vmem>>) attributes {dimension_semantics = [#tpu.dimension_semantics<parallel>], iteration_bounds = array<i64: 1>, scalar_prefetch = 0 : i64, scratch_operands = 0 : i64, tpu.core_type = #tpu.core_type<tc>, window_params = [{transform_indices = @transform_0, window_bounds = array<i64: 8, 256>}, {transform_indices = @transform_1, window_bounds = array<i64: 8, 256>}]} {
    %c0 = arith.constant 0 : index
    %c0_0 = arith.constant 0 : index
    %0 = vector.load %arg1[%c0, %c0_0] : memref<8x256xf32, #tpu.memory_space<vmem>>, vector<8x256xf32>
    %c0_1 = arith.constant 0 : index
    %c0_2 = arith.constant 0 : index
    %1 = vector.load %arg2[%c0_1, %c0_2] : memref<8x256xf32, #tpu.memory_space<vmem>>, vector<8x256xf32>
    tpu.vector_store %arg2[%c0_1, %c0_2], %0 {strides = array<i32>} : memref<8x256xf32, #tpu.memory_space<vmem>>, vector<8x256xf32>,
    return
  }
  func.func @transform_0(%arg0: i32) -> (i32, i32) {
    %c0_i32 = arith.constant 0 : i32
    %c0_i32_0 = arith.constant 0 : i32
    return %arg0, %c0_i32 : i32, i32
  }
  func.func @transform_1(%arg0: i32) -> (i32, i32) {
    %c0_i32 = arith.constant 0 : i32
    %c0_i32_0 = arith.constant 0 : i32
    return %arg0, %c0_i32 : i32, i32
  }
}

</mosaic_0001>

<bundles_post_ra>
// kernel: pallas_identity.1
= control target key start
LH: loop header
LB: loop body
LE: loop exit
PB: predicated region body
PF: predicated region fallthrough
CT: control target
= control target key end

     0   :  { %s38_s0 = inlined_call_operand.vmem [shape: f32[8,256], index: 0, kind: input, shape index: {}]   ;;  %s39_s1 = inlined_call_operand.vmem [shape: f32[8,256], index: 1, kind: output, shape index: {}]  }
   0x1   :  { %v8_v0 = vld [vmem:[%s38_s0] sm:$0xff]  ;;  %v9_v1 = vld [vmem:[%s38_s0 + $0x8] sm:$0xff] }
   0x2   :  { %10 = vst [vmem:[%s39_s1] sm:$0xff] %v8_v0  ;;  %11 = vst [vmem:[%s39_s1 + $0x8] sm:$0xff] %v9_v1 }

</bundles_post_ra>
